<compile_context>
chip_gen: v6e
topology: v6e:2x2x1
jax: 0.10.0
libtpu: 0.0.40
codegen_flags: <defaults>
</compile_context>

<pallas_src>
import functools

import numpy as np
import jax
import jax.numpy as jnp
from jax.experimental import pallas as pl
from jax.experimental.pallas import tpu as pltpu

_BN_EPS = 1e-5
_MAX_N_TILE = 1024        # stage-1/3 lane-aligned spatial tile target
_MAX_N_TILE_ATT = 4096    # stage-2 (attention reduction) tile target


def _round_up(v, m):
    return ((v + m - 1) // m) * m


def _vmem_limit_bytes():
    """~75% of per-core VMEM (generation aware), clamped; fallback 48 MiB."""
    cap = 64 * 1024 * 1024
    try:
        info = pltpu.get_tpu_info()
        cap = int(getattr(info, "vmem_capacity_bytes", cap)) or cap
    except Exception:
        pass
    cap = max(32 * 1024 * 1024, min(cap, 128 * 1024 * 1024))
    return (cap // 4) * 3


def _pick_n_tile(n, bytes_per_col, fixed_bytes, budget, max_tile):
    """Largest multiple-of-128 divisor of n whose working set fits `budget`."""
    if n % 128 != 0:
        return n                      # small / non-aligned N: one full tile
    t = min(n, max_tile)
    t -= t % 128
    while t > 128 and (n % t != 0 or t * bytes_per_col + fixed_bytes > budget):
        t -= 128
    return max(t, 128)


# ---------------------------------------------------------------------------
# Kernels
# ---------------------------------------------------------------------------
def _branch_kernel(x_ref, w_ref, b_ref, tm_ref, bot_ref, *, tm_rows, out_dtype):
    """All three 1x1-conv branches (BN folded) as ONE stacked matmul + ReLU."""
    x = x_ref[0].astype(out_dtype)                        # (C, t) -> bf16/f32
    y = jnp.dot(w_ref[...], x, preferred_element_type=jnp.float32)
    y = jnp.maximum(y + b_ref[...], 0.0)                  # bias & BN pre-folded
    tm_ref[0] = y[:tm_rows].astype(out_dtype)             # stacked [top | mid]
    bot_ref[0] = y[tm_rows:].astype(out_dtype)            # (C, t)


def _att_kernel(tm_ref, theta_ref, att_ref, *, cr):
    """att[b] += phi[b] @ theta[b], reduced over N tiles (1/N folded later)."""
    k = pl.program_id(2)

    @pl.when(k == 0)
    def _():
        att_ref[...] = jnp.zeros_like(att_ref)

    phi = tm_ref[0, :cr, :]                               # mid rows of stack
    att_ref[0] += jnp.dot(phi, theta_ref[0],
                          preferred_element_type=jnp.float32)


def _apply_kernel(gscale_ref, out0_ref, att_ref, x_ref, o_ref):
    """o = (gamma / N) * (out0 @ att_unscaled) + x, tiled over N."""
    y = jnp.dot(out0_ref[0].astype(jnp.float32), att_ref[0],
                preferred_element_type=jnp.float32)
    o_ref[0] = gscale_ref[0, 0] * y + x_ref[0]


# ---------------------------------------------------------------------------
# Parameter packing (one-time, host-side)
# ---------------------------------------------------------------------------
def pack_params(params, dtype=jnp.bfloat16):
    """Fold eval-mode BN into the convs, stack the branch weights [top|mid|bot]."""
    bn_scale = 1.0 / np.sqrt(1.0 + _BN_EPS)
    cr, c = params["w_top"].shape[0], params["w_bot"].shape[0]
    cr_pad = _round_up(cr, 8)                 # sublane-aligned slice offsets
    m = 2 * cr_pad + c
    idt = np.dtype(dtype)

    w_all = np.zeros((m, c), np.float32)
    b_all = np.zeros((m, 1), np.float32)
    for off, rows, wk, bk in ((0, cr, "w_top", "b_top"),
                              (cr_pad, cr, "w_mid", "b_mid"),
                              (2 * cr_pad, c, "w_bot", "b_bot")):
        w_all[off:off + rows] = bn_scale * np.asarray(params[wk])
        b_all[off:off + rows] = bn_scale * np.asarray(params[bk])

    return dict(w_all=jnp.asarray(w_all, idt),
                b_all=jnp.asarray(b_all, jnp.float32),
                gamma=jnp.asarray(params["gamma"], jnp.float32).reshape(1, 1),
                dtype=idt, cr=int(cr), cr_pad=int(cr_pad), c=int(c))


# ---------------------------------------------------------------------------
# Wrapper
# ---------------------------------------------------------------------------
def simple_self_attention(x, packed):
    B, C, H, W = x.shape
    N = H * W
    assert C == packed["c"], "packed params were built for a different C"
    cr, cr_pad = packed["cr"], packed["cr_pad"]
    tm_rows = 2 * cr_pad
    m = tm_rows + C
    idt = packed["dtype"]
    isz = idt.itemsize
    vlimit = _vmem_limit_bytes()
    budget = (vlimit // 10) * 8            # headroom for compiler scratch

    cparams = functools.partial(pltpu.CompilerParams, vmem_limit_bytes=vlimit)

    # ---- stage 1: stacked branch convolutions -> [top|mid] and bot ----
    s1_col = 2 * (C * 4 + C * isz + tm_rows * isz)        # double-buffered tiles
    s1_fix = 2 * m * C * isz + m * 4 + (1 << 20)          # weights + bias + slack
    n_tile = _pick_n_tile(N, s1_col, s1_fix, budget, _MAX_N_TILE)
    nt = N // n_tile

    x_cn = x.reshape(B, C, N)              # channel-major view (same flat bytes)

    tm, bot = pl.pallas_call(
        functools.partial(_branch_kernel, tm_rows=tm_rows, out_dtype=idt),
        grid=(B, nt),
        in_specs=[pl.BlockSpec((1, C, n_tile), lambda b, j: (b, 0, j)),
                  pl.BlockSpec((m, C), lambda b, j: (0, 0)),
                  pl.BlockSpec((m, 1), lambda b, j: (0, 0))],
        out_specs=(pl.BlockSpec((1, tm_rows, n_tile), lambda b, j: (b, 0, j)),
                   pl.BlockSpec((1, C, n_tile), lambda b, j: (b, 0, j))),
        out_shape=(jax.ShapeDtypeStruct((B, tm_rows, N), idt),
                   jax.ShapeDtypeStruct((B, C, N), idt)),
        compiler_params=cparams(dimension_semantics=("parallel", "parallel")),
    )(x_cn, packed["w_all"], packed["b_all"])

    # literal row-major reshapes exactly as in the PyTorch forward (bitcasts)
    theta = bot.reshape(B, N, C)             # bot_branch(x).reshape(B, N, -1)
    out0 = tm[:, :cr, :].reshape(B, N, cr)   # top_branch(x).reshape(B, N, -1)

    # ---- stage 2: att = phi @ theta (unscaled); N is the reduction axis ----
    n_cb = 2 if (C % 256 == 0) else 1        # split C so both v7x cores help
    ct = C // n_cb
    s2_col = 2 * (cr_pad * isz + C * isz)
    s2_fix = 2 * cr * ct * 4 + (1 << 20)
    t2 = _pick_n_tile(N, s2_col, s2_fix, budget, _MAX_N_TILE_ATT)
    nt2 = N // t2

    att = pl.pallas_call(
        functools.partial(_att_kernel, cr=cr),
        grid=(B, n_cb, nt2),
        in_specs=[pl.BlockSpec((1, cr_pad, t2), lambda b, cj, k: (b, 1, k)),
                  pl.BlockSpec((1, t2, ct), lambda b, cj, k: (b, k, cj))],
        out_specs=pl.BlockSpec((1, cr, ct), lambda b, cj, k: (b, 0, cj)),
        out_shape=jax.ShapeDtypeStruct((B, cr, C), jnp.float32),
        compiler_params=cparams(
            dimension_semantics=("parallel", "parallel", "arbitrary")),
    )(tm, theta)

    # ---- stage 3: o = (gamma/N) * (out0 @ att) + x, residual fused ----
    s3_col = 2 * (C * 4 + C * 4 + max(cr, 128) * isz)
    s3_fix = cr * C * 4 + (1 << 20)
    t3 = _pick_n_tile(N, s3_col, s3_fix, budget, _MAX_N_TILE)
    nt3 = N // t3

    x_nc = x.reshape(B, N, C)              # row-major view for the fused residual
    gscale = packed["gamma"] * (1.0 / N)   # fold the 1/N attention scale here

    out_nc = pl.pallas_call(
        _apply_kernel,
        grid=(B, nt3),
        in_specs=[pl.BlockSpec(memory_space=pltpu.MemorySpace.SMEM),  # gamma/N
                  pl.BlockSpec((1, t3, cr), lambda b, j: (b, j, 0)),
                  pl.BlockSpec((1, cr, C), lambda b, j: (b, 0, 0)),
                  pl.BlockSpec((1, t3, C), lambda b, j: (b, j, 0))],
        out_specs=pl.BlockSpec((1, t3, C), lambda b, j: (b, j, 0)),
        out_shape=jax.ShapeDtypeStruct((B, N, C), x.dtype),
        compiler_params=cparams(dimension_semantics=("parallel", "parallel")),
    )(gscale, out0, att, x_nc)

    # final literal reshape back to NCHW (bitcast of the same flat bytes)
    return out_nc.reshape(B, C, H, W)


# ---------------------------------------------------------------------------
# Pure-JAX reference (mirrors the PyTorch forward)
# ---------------------------------------------------------------------------
def reference(x, params):
    B, C, H, W = x.shape
    N = H * W
    bn_scale = 1.0 / np.sqrt(1.0 + _BN_EPS)
    hi = jax.lax.Precision.HIGHEST

    def branch(w, b):
        y = jnp.einsum("oc,bchw->bohw", w, x, precision=hi) + b.reshape(1, -1, 1, 1)
        return jnp.maximum(y * bn_scale, 0.0)

    phi = branch(params["w_mid"], params["b_mid"]).reshape(B, -1, N)
    theta = branch(params["w_bot"], params["b_bot"]).reshape(B, N, -1)
    attention = jnp.matmul(phi, theta, precision=hi) / N
    out = branch(params["w_top"], params["b_top"]).reshape(B, N, -1)
    out = jnp.matmul(out, attention, precision=hi).reshape(B, -1, H, W)
    return params["gamma"].reshape(()) * out + x


# ---------------------------------------------------------------------------
# Deterministic parameter init (shapes from the module's __init__)
# ---------------------------------------------------------------------------
def init_params(key, channels, ratio=8):
    cr = channels // ratio
    ks = jax.random.split(key, 6)
    scale = 0.1
    return dict(
        w_top=scale * jax.random.normal(ks[0], (cr, channels), jnp.float32),
        b_top=scale * jax.random.normal(ks[1], (cr, 1), jnp.float32),
        w_mid=scale * jax.random.normal(ks[2], (cr, channels), jnp.float32),
        b_mid=scale * jax.random.normal(ks[3], (cr, 1), jnp.float32),
        w_bot=scale * jax.random.normal(ks[4], (channels, channels), jnp.float32),
        b_bot=scale * jax.random.normal(ks[5], (channels, 1), jnp.float32),
        gamma=jnp.zeros((1, 1), jnp.float32),   # nn.Parameter(torch.zeros(1))
    )


if __name__ == "__main__":
    key = jax.random.PRNGKey(0)
    k1, k2, k3, k4 = jax.random.split(key, 4)

    # --- toy, non-128-aligned spatial size (single-tile path), bf16 default ---
    B, C, H, W = 2, 16, 8, 8
    x = jax.random.normal(k1, (B, C, H, W), jnp.float32)
    params = init_params(k2, C, ratio=8)

    out = jax.block_until_ready(simple_self_attention(x, pack_params(params)))
    assert out.shape == x.shape
    np.testing.assert_allclose(np.asarray(out), np.asarray(reference(x, params)),
                               rtol=5e-2, atol=5e-2)

    # non-zero gamma exercises the attention path non-trivially
    params_nz = dict(params, gamma=jnp.full((1, 1), 0.5, jnp.float32))
    out_nz = jax.block_until_ready(
        simple_self_attention(x, pack_params(params_nz)))
    np.testing.assert_allclose(np.asarray(out_nz),
                               np.asarray(reference(x, params_nz)),
                               rtol=5e-2, atol=5e-2)

    # f32 intermediates: tight-tolerance structural check of the same pipeline
    out_f32 = jax.block_until_ready(
        simple_self_attention(x, pack_params(params_nz, dtype=jnp.float32)))
    np.testing.assert_allclose(np.asarray(out_f32),
                               np.asarray(reference(x, params_nz)),
                               rtol=2e-4, atol=2e-4)

    # --- lane-aligned multi-tile path (N = 8192, C % 256 == 0): exercises the
    #     N-reduction accumulator, stage-2 C split and bf16 intermediates ---
    B2, C2, H2, W2 = 1, 256, 64, 128
    x2 = jax.random.normal(k3, (B2, C2, H2, W2), jnp.float32)
    params2 = init_params(k4, C2, ratio=8)
    params2 = dict(params2, gamma=jnp.full((1, 1), 0.7, jnp.float32))
    out2 = jax.block_until_ready(
        simple_self_attention(x2, pack_params(params2)))
    np.testing.assert_allclose(np.asarray(out2),
                               np.asarray(reference(x2, params2)),
                               rtol=5e-2, atol=5e-2)

    print("KERNEL_OK")
</pallas_src>

<mosaic_0001>
module attributes {stable_mosaic.version = 11 : i64} {
  func.func @_branch_kernel(%arg0: i32, %arg1: i32, %arg2: memref<1x16x64xf32, #tpu.memory_space<vmem>>, %arg3: memref<32x16xbf16, #tpu.memory_space<vmem>>, %arg4: memref<32x1xf32, #tpu.memory_space<vmem>>, %arg5: memref<1x16x64xbf16, #tpu.memory_space<vmem>>, %arg6: memref<1x16x64xbf16, #tpu.memory_space<vmem>>) attributes {dimension_semantics = [#tpu.dimension_semantics<parallel>, #tpu.dimension_semantics<parallel>], iteration_bounds = array<i64: 2, 1>, scalar_prefetch = 0 : i64, scratch_operands = 0 : i64, tpu.core_type = #tpu.core_type<tc>, window_params = [{transform_indices = @transform_0, window_bounds = array<i64: 1, 16, 64>}, {pipeline_mode = #tpu.pipeline_mode<synchronous>, transform_indices = @transform_1, window_bounds = array<i64: 32, 16>}, {pipeline_mode = #tpu.pipeline_mode<synchronous>, transform_indices = @transform_2, window_bounds = array<i64: 32, 1>}, {transform_indices = @transform_3, window_bounds = array<i64: 1, 16, 64>}, {transform_indices = @transform_4, window_bounds = array<i64: 1, 16, 64>}]} {
    %c0 = arith.constant 0 : index
    %c0_0 = arith.constant 0 : index
    %c0_1 = arith.constant 0 : index
    %0 = vector.load %arg2[%c0, %c0_0, %c0_1] : memref<1x16x64xf32, #tpu.memory_space<vmem>>, vector<1x16x64xf32>
    %1 = vector.shape_cast %0 : vector<1x16x64xf32> to vector<16x64xf32>
    %2 = arith.truncf %1 : vector<16x64xf32> to vector<16x64xbf16>
    %c0_2 = arith.constant 0 : index
    %c0_3 = arith.constant 0 : index
    %3 = vector.load %arg3[%c0_2, %c0_3] : memref<32x16xbf16, #tpu.memory_space<vmem>>, vector<32x16xbf16>
    %cst = arith.constant dense<0.000000e+00> : vector<32x64xf32>
    %4 = tpu.matmul %3, %2, %cst {dimension_numbers = #tpu.dot_dimension_numbers<[1], [0], [0], [1], [0, 0, 1, 1], [], []>} : vector<32x16xbf16>, vector<16x64xbf16>, vector<32x64xf32> -> vector<32x64xf32>
    %c0_4 = arith.constant 0 : index
    %c0_5 = arith.constant 0 : index
    %5 = vector.load %arg4[%c0_4, %c0_5] : memref<32x1xf32, #tpu.memory_space<vmem>>, vector<32x1xf32>
    %6 = vector.broadcast %5 : vector<32x1xf32> to vector<32x64xf32>
    %7 = arith.addf %4, %6 : vector<32x64xf32>
    %cst_6 = arith.constant 0.000000e+00 : f32
    %8 = vector.broadcast %cst_6 : f32 to vector<32x64xf32>
    %9 = arith.maximumf %7, %8 : vector<32x64xf32>
    %10 = vector.extract_strided_slice %9 {offsets = [0, 0], sizes = [16, 64], strides = [1, 1]} : vector<32x64xf32> to vector<16x64xf32>
    %11 = arith.truncf %10 : vector<16x64xf32> to vector<16x64xbf16>
    %c0_7 = arith.constant 0 : index
    %c0_8 = arith.constant 0 : index
    %c0_9 = arith.constant 0 : index
    %12 = vector.load %arg5[%c0_7, %c0_8, %c0_9] : memref<1x16x64xbf16, #tpu.memory_space<vmem>>, vector<1x16x64xbf16>
    %13 = vector.shape_cast %12 : vector<1x16x64xbf16> to vector<16x64xbf16>
    %14 = vector.shape_cast %11 : vector<16x64xbf16> to vector<1x16x64xbf16>
    tpu.vector_store %arg5[%c0_7, %c0_8, %c0_9], %14 {strides = array<i32>} : memref<1x16x64xbf16, #tpu.memory_space<vmem>>, vector<1x16x64xbf16>,
    %15 = vector.extract_strided_slice %9 {offsets = [16, 0], sizes = [16, 64], strides = [1, 1]} : vector<32x64xf32> to vector<16x64xf32>
    %16 = arith.truncf %15 : vector<16x64xf32> to vector<16x64xbf16>
    %c0_10 = arith.constant 0 : index
    %c0_11 = arith.constant 0 : index
    %c0_12 = arith.constant 0 : index
    %17 = vector.load %arg6[%c0_10, %c0_11, %c0_12] : memref<1x16x64xbf16, #tpu.memory_space<vmem>>, vector<1x16x64xbf16>
    %18 = vector.shape_cast %17 : vector<1x16x64xbf16> to vector<16x64xbf16>
    %19 = vector.shape_cast %16 : vector<16x64xbf16> to vector<1x16x64xbf16>
    tpu.vector_store %arg6[%c0_10, %c0_11, %c0_12], %19 {strides = array<i32>} : memref<1x16x64xbf16, #tpu.memory_space<vmem>>, vector<1x16x64xbf16>,
    return
  }
  func.func @transform_0(%arg0: i32, %arg1: i32) -> (i32, i32, i32) {
    %c0_i32 = arith.constant 0 : i32
    %c0_i32_0 = arith.constant 0 : i32
    return %arg0, %c0_i32, %arg1 : i32, i32, i32
  }
  func.func @transform_1(%arg0: i32, %arg1: i32) -> (i32, i32) {
    %c0_i32 = arith.constant 0 : i32
    %c0_i32_0 = arith.constant 0 : i32
    %c0_i32_1 = arith.constant 0 : i32
    return %c0_i32, %c0_i32_0 : i32, i32
  }
  func.func @transform_2(%arg0: i32, %arg1: i32) -> (i32, i32) {
    %c0_i32 = arith.constant 0 : i32
    %c0_i32_0 = arith.constant 0 : i32
    %c0_i32_1 = arith.constant 0 : i32
    return %c0_i32, %c0_i32_0 : i32, i32
  }
  func.func @transform_3(%arg0: i32, %arg1: i32) -> (i32, i32, i32) {
    %c0_i32 = arith.constant 0 : i32
    %c0_i32_0 = arith.constant 0 : i32
    return %arg0, %c0_i32, %arg1 : i32, i32, i32
  }
  func.func @transform_4(%arg0: i32, %arg1: i32) -> (i32, i32, i32) {
    %c0_i32 = arith.constant 0 : i32
    %c0_i32_0 = arith.constant 0 : i32
    return %arg0, %c0_i32, %arg1 : i32, i32, i32
  }
}

</mosaic_0001>

<bundles_post_ra>
// kernel: tpu_custom_call.1
= control target key start
LH: loop header
LB: loop body
LE: loop exit
PB: predicated region body
PF: predicated region fallthrough
CT: control target
= control target key end

     0   :  { %10 = vsyncpa [#allocation3], 0  ;;  %s932_s0 = inlined_call_operand.vmem [shape: f32[2,16,64], index: 0, kind: input, shape index: {}]   ;;  %s933_s1 = inlined_call_operand.vmem [shape: bf16[32,16], index: 1, kind: input, shape index: {}]   ;;  %s934_s2 = inlined_call_operand.vmem [shape: f32[32,1], index: 2, kind: input, shape index: {}]   ;;  %s935_s3 = inlined_call_operand.hbm [shape: bf16[2,16,64], index: 3, kind: output, shape index: {0}]   ;;  %s936_s4 = inlined_call_operand.hbm [shape: bf16[2,16,64], index: 4, kind: output, shape index: {1}]  }
   0x1   :  { %12 = vsyncpa [#allocation3 + $0x1], 0 }
   0x2   :  { %13 = vsyncpa [#allocation5], 0 }
   0x3   :  { %15 = vsyncpa [#allocation5 + $0x1], 0  ;;  %s752_s15 = smov 0   ;;  %s754_s16 = smov 0  }
   0x4   :  { %s756_s17 = smov 0   ;;  %s758_s18 = smov 0  }
   0x5   :  { %s760_s19 = smov 0   ;;  %s762_s20 = smov 0  }
   0x6 LB: > { %s506_s21 = sadd.s32 4294967295, %s720_s20   ;;  %s507_s22 = sadd.s32 4294967294, %s720_s20   ;;  %s720_s20 = sphi %s762_s20, %s21_s20   ;;  %s716_s19 = sphi %s760_s19, %s943_s19   ;;  %s712_s18 = sphi %s758_s18, %s942_s18   ;;  %s708_s17 = sphi %s756_s17, %s941_s17   ;;  %s704_s16 = sphi %s754_s16, %s940_s16   ;;  %s700_s15 = sphi %s752_s15, %s939_s15  }
   0x7   : > { %s33_s23 = sadd.s32 1, %s716_s19  ;;  %s112_s24 = sadd.s32 1, %s708_s17 }
   0x8   : > { %p35_p0 = scmp.ge.s32.totalorder %s33_s23, 2  ;;  %p122_p1 = scmp.ne.s32.totalorder %s708_s17, %s704_s16 }
   0x9   : > { %p123_p2 = scmp.eq.s32.totalorder %s506_s21, 1  ;;  %p128_p3 = scmp.ne.s32.totalorder %s704_s16, %s700_s15 }
   0xa   : > { %s945_s23 = smov (%p35_p0, %s33_s23), 0  ;;  %p129_p5 = scmp.eq.s32.totalorder %s507_s22, 1 }
   0xb   : > { %p792_p4 = por %p123_p2, %p122_p1  ;;  %s107_s26 = ssub.s32 %s716_s19, %s945_s23 }
   0xc   : > { %p510_p6 = scmp.ge.s32.totalorder %s720_s20, 1  ;;  %p110_p7 = scmp.eq.s32.totalorder %s107_s26, 0 }
   0xd   : > { %p799_p8 = por %p129_p5, %p128_p3  ;;  %p192_p9 = scmp.lt.s32.totalorder %s720_s20, 3 }
   0xe   : > { %s805_s28 = scalar_select %p110_p7, %s708_s17, %s112_s24  }
   0xf   : > { %p193_p10 = pnand %p510_p6, %p192_p9 }
  0x10   : > { %p226_p11 = scmp.lt.s32.totalorder (!%p193_p10), %s712_s18, 1  ;;  %s833_s30 = sand.u32 (!%p193_p10), 1, %s704_s16  }
  0x11   : > { %196 = sbr.rel (%p193_p10) target bundleno = 272 (0x110), region = 32  ;;  %s536_s8 = sshll.u32 (!%p193_p10), %s712_s18, 7 }
  0x12   : > { %s848_s12 = scalar_lea.hbm (!%p193_p10), %s936_s4, %s536_s8  ;;  %s856_s21 = scalar_lea.hbm (!%p193_p10), %s935_s3, %s536_s8 }
  0x13   : > { %s363_s22 = scalar_lea.sflag (!%p193_p10), [#allocation5], %s833_s30  ;;  %s723_s26 = smov (!%p193_p10), [#allocation4]  }
  0x14   : > { %s618_s29 = sshll.u32 (!%p193_p10), %s723_s26, 4  ;;  %s619_s29 = int_to_ptr.vmem [resolvable:$false] %s618_s29 }
  0x16   : > { %v612_v0 = vld [vmem:[%s933_s1] sm:$0xff]   ;;  %vm276_vm0 = vcmask 130048   ;;  %s227_s5 = scalar_select %p226_p11, %s712_s18, 1  ;;  %v244_v1 = vld [vmem:[%s934_s2 + $0x10] sm:$0xff]  ;;  %v722_v3 = vmov 0   ;;  %v245_v4 = vld [vmem:[%s934_s2 + $0x18] sm:$0xff] }
  0x17   : > { %543 = vmatprep.mubr.msk.bf16.mxu0 %vm276_vm0, %v612_v0  ;;  %v242_v2 = vld [vmem:[%s934_s2] sm:$0xff]  ;;  %611 = vset.pattern.permute.xlu1 %v722_v3  ;;  %v243_v5 = vld [vmem:[%s934_s2 + $0x8] sm:$0xff]  ;;  %vm344_vm1 = vcmask 519168  }
  0x18   : > { %610 = vset.pattern.permute.xlu0 %v722_v3  ;;  %s531_s10 = sshll.u32 %s227_s5, 4  ;;  %258 = vperm.xlu1 %611, %v244_v1   ;;  %v613_v9 = vld [vmem:[%s933_s1 + $0x8] sm:$0xff]   ;;  %s511_s5 = sshll.u32 %s833_s30, 3 }
  0x19   : > { %248 = vperm.xlu0 %610, %v242_v2   ;;  %s233_s13 = scalar_lea.vmem %s932_s0, %s531_s10  ;;  %s225_s6 = scalar_lea.vmem [#allocation4], %s511_s5 }
  0x1a   : > { %v235_v6 = vld [vmem:[%s233_s13] sm:$0xff]  ;;  %v236_v7 = vld [vmem:[%s233_s13 + $0x8] sm:$0xff]  ;;  %s394_s7 = sshll.u32 %s225_s6, 4  ;;  %s840_s9 = scalar_lea.vmem [#allocation2], %s511_s5  ;;  %s838_s7 = int_to_ptr.vmem [resolvable:$true] %s394_s7 }
  0x1b   : > { %v237_v8 = vpack.c.bf16 %v236_v7, %v235_v6  ;;  %s377_s10 = sshll.u32 %s840_s9, 4  ;;  %s614_s24 = scalar_lea.vmem %s838_s7, 128  ;;  %s850_s10 = int_to_ptr.vmem [resolvable:$true] %s377_s10 }
  0x1c   : > { %263 = vperm.xlu1 %611, %v245_v4   ;;  %p615_p12 = scmp.ne.s32.totalorder %s838_s7, %s614_s24  ;;  %s620_s5 = scalar_lea.vmem %s619_s29, 256 }
  0x1d   : > { %253 = vperm.xlu0 %610, %v243_v5   ;;  %541 = vmatprep.subr.bf16.mxu0 %v237_v8  ;;  %p621_p1 = scmp.lt.s32.totalorder %s838_s7, %s619_s29  ;;  %p622_p2 = scmp.lt.s32.totalorder %s620_s5, %s614_s24 }
  0x1e   : > { %542 = vmatpush3.bf16.msra.mxu0 %v237_v8  ;;  %p616_p13 = pnand %p615_p12, %p792_p4 }
  0x1f   : > { %p623_p3 = por %p622_p2, %p621_p1 }
  0x20   : > { %p617_p0 = pneg %p616_p13 }
  0x21   : > { %544 = vmatmul.mubr.msk.bf16.vlgmr.msra.gmra.mxu0 %vm276_vm0, %v613_v9 }
  0x22   : > { %p624_p5 = pnand %p623_p3, %p617_p0 }
  0x93   : > { %v259_v10 = vpop.permute.xlu1 %258 }
  0x94   : > { %v249_v11 = vpop.permute.xlu0 %248 }
  0x97   : > { %v264_v17 = vpop.permute.xlu1 %263 }
  0x98   : > { %v254_v22 = vpop.permute.xlu0 %253 }
  0xe1   : > { %v545_v12 = vpop.f32.mrf.mxu0 }
  0xe2   : > { %v326_v13 = vadd.f32 %v545_v12, %v259_v10 }
  0xe3   : > { %v317_v14 = vpop.f32.mrf.mxu0 }
  0xe4   : > { %v334_v15 = vmax.f32 %v326_v13, 0.0  ;;  %v318_v16 = vadd.f32 %v317_v14, %v249_v11 }
  0xe5   : > { %v546_v18 = vpop.f32.mrf.mxu0 }
  0xe6   : > { %v534_v19 = vpack.c.bf16 %v334_v15, %v334_v15  ;;  %v332_v20 = vmax.f32 %v318_v16, 0.0  ;;  %v329_v21 = vadd.f32 %v546_v18, %v264_v17 }
  0xe7   : > { %v320_v23 = vpop.f32.mrf.mxu0 }
  0xe8   : > { %355 = vst.msk [vmem:[%s225_s6] sm:$0xf] %vm344_vm1, %v534_v19  ;;  %v532_v24 = vpack.c.bf16 %v332_v20, %v332_v20  ;;  %v335_v25 = vmax.f32 %v329_v21, 0.0  ;;  %v321_v26 = vadd.f32 %v320_v23, %v254_v22 }
  0xea   : > { %345 = vst.msk [vmem:[%s840_s9] sm:$0xf] %vm344_vm1, %v532_v24  ;;  %v535_v27 = vpack.c.bf16 %v335_v25, %v335_v25  ;;  %v333_v28 = vmax.f32 %v321_v26, 0.0 }
  0xec   : > { %356 = vst.msk [vmem:[%s225_s6 + $0x4] sm:$0xf] %vm344_vm1, %v535_v27  ;;  %v533_v29 = vpack.c.bf16 %v333_v28, %v333_v28 }
  0xed   : > { %627 = shalt.err (!%p624_p5)
}
  0xee   : > { %s628_s6 = scalar_lea.hbm %s848_s12, 128  ;;  %s632_s11 = scalar_lea.hbm %s936_s4, 256 }
  0xef   : > { %p629_p6 = scmp.ne.s32.totalorder %s848_s12, %s628_s6  ;;  %p633_p10 = scmp.lt.s32.totalorder %s848_s12, %s936_s4 }
  0xf0   : > { %p634_p11 = scmp.lt.s32.totalorder %s632_s11, %s628_s6 }
  0xf1   : > { %p630_p7 = pnand %p629_p6, %p792_p4 }
  0xf2   : > { %p635_p12 = por %p634_p11, %p633_p10 }
  0xf3   : > { %p631_p9 = pneg %p630_p7 }
  0xf5   : > { %p636_p13 = pnand %p635_p12, %p631_p9 }
  0xf7   : > { %639 = shalt.err (!%p636_p13)
}
  0xf8   : > { %s724_s24 = smov 64   ;;  %s725_s26 = smov 4   ;;  %346 = vst.msk [vmem:[%s840_s9 + $0x4] sm:$0xf] %vm344_vm1, %v533_v29 }
  0xf9   : > { %548 = dma.vmem_to_hbm [thread:$0]  (%p792_p4), %s838_s7, 128, %s848_s12, %s363_s22, %s724_s24, %s724_s24, %s725_s26  }
  0xfa   : > { %s358_s29 = scalar_lea.sflag [#allocation3], %s833_s30  ;;  %s640_s5 = scalar_lea.vmem %s850_s10, 128 }
  0xfb   : > { %p641_p0 = scmp.ne.s32.totalorder %s850_s10, %s640_s5  ;;  %s726_s6 = smov [#allocation2]  }
  0xfc   : > { %s644_s8 = sshll.u32 %s726_s6, 4  ;;  %s645_s8 = int_to_ptr.vmem [resolvable:$false] %s644_s8 }
  0xfd   : > { %p642_p1 = pnand %p641_p0, %p792_p4  ;;  %s646_s18 = scalar_lea.vmem %s645_s8, 256 }
  0xfe   : > { %p647_p3 = scmp.lt.s32.totalorder %s850_s10, %s645_s8  ;;  %p648_p5 = scmp.lt.s32.totalorder %s646_s18, %s640_s5 }
  0xff   : > { %p643_p2 = pneg %p642_p1 }
 0x100   : > { %p649_p6 = por %p648_p5, %p647_p3 }
 0x102   : > { %p650_p7 = pnand %p649_p6, %p643_p2 }
 0x104   : > { %653 = shalt.err (!%p650_p7)
}
 0x105   : > { %s654_s7 = scalar_lea.hbm %s856_s21, 128  ;;  %s658_s12 = scalar_lea.hbm %s935_s3, 256 }
 0x106   : > { %p655_p9 = scmp.ne.s32.totalorder %s856_s21, %s654_s7  ;;  %p659_p12 = scmp.lt.s32.totalorder %s856_s21, %s935_s3 }
 0x107   : > { %p660_p13 = scmp.lt.s32.totalorder %s658_s12, %s654_s7 }
 0x108   : > { %p656_p10 = pnand %p655_p9, %p792_p4 }
 0x109   : > { %p661_p0 = por %p660_p13, %p659_p12 }
 0x10a   : > { %p657_p11 = pneg %p656_p10 }
 0x10c   : > { %p662_p1 = pnand %p661_p0, %p657_p11 }
 0x10e   : > { %665 = shalt.err (!%p662_p1)
}
 0x10f   : > { %547 = dma.vmem_to_hbm [thread:$0]  (%p792_p4), %s850_s10, 128, %s856_s21, %s358_s29, %s724_s24, %s724_s24, %s725_s26  }
 0x110 PF: > { %p558_p2 = scmp.ge.s32.totalorder %s720_s20, 2  ;;  %s409_s13 = sand.u32 1, %s700_s15  }
 0x111   : > { %s410_s14 = scalar_lea.sflag [#allocation3], %s409_s13 }
 0x112   : > { %p552_p3 = pnand %p558_p2, %p799_p8 }
 0x114   : > { %p553_p5 = pneg %p552_p3 }
 0x116   : > { %691 = dma.done.wait (%p553_p5), %s410_s14, 128  }
 0x117   : > { %693 = vsyncadd (%p553_p5), %s410_s14, 4294967168  ;;  %s419_s5 = scalar_lea.sflag [#allocation5], %s409_s13 }
 0x118   : > { %695 = dma.done.wait (%p553_p5), %s419_s5, 128  }
 0x119   : > { %697 = vsyncadd (%p553_p5), %s419_s5, 4294967168  ;;  %s21_s20 = sadd.s32 1, %s720_s20   ;;  %s939_s15 = smov %s704_s16 }
 0x11a   : > { %p18_p6 = scmp.ge.s32.totalorder %s21_s20, 4   ;;  %s940_s16 = smov %s708_s17 }
 0x11b   : > { %s941_s17 = smov %s805_s28  ;;  %s942_s18 = smov %s716_s19 }
 0x11c   : > { %s943_s19 = smov %s945_s23  ;;  %20 = sbr.rel (!%p18_p6) target bundleno = 6 (0x6), region = 84 }
 0x121   :  { %424 = vsyncpa [#allocation3], 1 }
 0x122   :  { %426 = vsyncpa [#allocation3 + $0x1], 1 }
 0x123   :  { %427 = vsyncpa [#allocation5], 1 }
 0x124   :  { %429 = vsyncpa [#allocation5 + $0x1], 1 }

</bundles_post_ra>
